<compile_context>
chip_gen: v7x
topology: tpu7x:2x2x1
jax: 0.10.0
libtpu: 0.0.40
codegen_flags: <defaults>
</compile_context>

<pallas_src>
import jax
import jax.numpy as jnp
from jax.experimental import pallas as pl
from jax.experimental.pallas import tpu as pltpu


def _relu_kernel(x_ref, o_ref):
    # Elementwise max(x, 0): one VPU vmax per vreg, no zero tile materialized.
    o_ref[...] = jnp.maximum(x_ref[...], 0.0)


def _lane_dense_view(x):
    """Reshape a contiguous NCHW tensor to a lane-dense 2-D slab (rows, lane)."""
    n, c, h, w = x.shape
    rows = n * c
    lane = h * w
    # Fold channel groups into the lane dimension so each row spans many
    # 128-lane vregs, e.g. (1,1232,14,14) -> (77, 3136).
    group = 1
    while rows % (group * 2) == 0 and (group * 2) * lane <= 8192:
        group *= 2
    rows //= group
    lane *= group
    return x.reshape(rows, lane), rows, lane


def _num_tensorcores() -> int:
    """Best-effort TensorCore count per chip (1 on v5e/v6e, 2 on v7x)."""
    try:
        info = pltpu.get_tpu_info()
        for attr in ("num_cores", "core_count", "num_tensorcores", "cores_per_chip"):
            n = getattr(info, attr, None)
            if isinstance(n, int) and n > 0:
                return n
    except Exception:
        pass
    try:
        kind = jax.devices()[0].device_kind.lower()
        if "7" in kind:  # v7x family: 2 TensorCores per chip
            return 2
    except Exception:
        pass
    return 1


def _vmem_capacity_bytes() -> int:
    """Best-effort per-core VMEM capacity; conservative 64 MiB if unknown."""
    try:
        info = pltpu.get_tpu_info()
        for attr in ("vmem_capacity_bytes", "vmem_bytes", "vmem_size_bytes"):
            n = getattr(info, attr, None)
            if isinstance(n, int) and n > 0:
                return n
    except Exception:
        pass
    return 64 * 1024 * 1024


def relu_pallas(x: jax.Array) -> jax.Array:
    """ReLU over an NCHW tensor, computed inside a Pallas TPU kernel."""
    orig_shape = x.shape
    x2d, rows, lane = _lane_dense_view(x)
    itemsize = jnp.dtype(x.dtype).itemsize

    # Dtype-aware sublane granule: f32 -> 8, bf16 -> 16, int8/fp8 -> 32.
    sublane = max(8, 32 // itemsize)

    # Hardware-dependent knobs (static, queried at trace time).
    num_cores = _num_tensorcores()
    vmem_bytes = _vmem_capacity_bytes()
    # ~4 MiB/buffer on 128 MiB-VMEM chips (v5e/v6e), ~2 MiB on 64 MiB (v7x).
    tile_cap = (4 if vmem_bytes > 64 * 1024 * 1024 else 2) * 1024 * 1024

    # Row tiling:
    #   * 1 TC  -> one grid step with the full array as the block,
    #   * >=2 TC -> >=2 steps per core so DMA-in/compute/DMA-out overlap
    #     within each core,
    #   * per-buffer tile capped at tile_cap so double-buffered in+out stays
    #     well inside the scoped-VMEM default on every generation.
    target_steps = 1 if num_cores <= 1 else 2 * num_cores
    max_rows_cap = max(sublane, (tile_cap // (lane * itemsize)) // sublane * sublane)
    rows_per_block = min(-(-rows // target_steps), max_rows_cap)
    if rows_per_block >= rows:
        rows_per_block = rows                       # full-dim block: exact, unmasked
    else:
        rows_per_block = -(-rows_per_block // sublane) * sublane
        if rows_per_block >= rows:
            rows_per_block = rows
    grid = (pl.cdiv(rows, rows_per_block),)

    out2d = pl.pallas_call(
        _relu_kernel,
        out_shape=jax.ShapeDtypeStruct(x2d.shape, x2d.dtype),
        grid=grid,
        in_specs=[pl.BlockSpec((rows_per_block, lane), lambda i: (i, 0))],
        out_specs=pl.BlockSpec((rows_per_block, lane), lambda i: (i, 0)),
        compiler_params=pltpu.CompilerParams(
            dimension_semantics=("parallel",)
        ),
    )(x2d)

    return out2d.reshape(orig_shape)


if __name__ == "__main__":
    key = jax.random.PRNGKey(0)
    # Same shape as the PyTorch module's example input x120.
    x = jax.random.normal(key, (1, 1232, 14, 14), dtype=jnp.float32)

    # Reference computed first (plain JAX).
    ref = jnp.maximum(x, 0.0)

    relu = jax.jit(relu_pallas)
    y = relu(x)
    jax.block_until_ready(y)

    assert y.shape == x.shape and y.dtype == x.dtype
    assert jnp.array_equal(y, ref)

    print("KERNEL_OK")
</pallas_src>

<mosaic_0001>
module attributes {stable_mosaic.version = 11 : i64} {
  func.func @_relu_kernel(%arg0: i32, %arg1: memref<77x3136xf32, #tpu.memory_space<vmem>>, %arg2: memref<77x3136xf32, #tpu.memory_space<vmem>>) attributes {dimension_semantics = [#tpu.dimension_semantics<parallel>], iteration_bounds = array<i64: 1>, scalar_prefetch = 0 : i64, scratch_operands = 0 : i64, tpu.core_type = #tpu.core_type<tc>, window_params = [{transform_indices = @transform_0, window_bounds = array<i64: 77, 3136>}, {transform_indices = @transform_1, window_bounds = array<i64: 77, 3136>}]} {
    %c0 = arith.constant 0 : index
    %c0_0 = arith.constant 0 : index
    %0 = vector.load %arg1[%c0, %c0_0] : memref<77x3136xf32, #tpu.memory_space<vmem>>, vector<77x3136xf32>
    %cst = arith.constant 0.000000e+00 : f32
    %1 = vector.broadcast %cst : f32 to vector<77x3136xf32>
    %2 = arith.maximumf %0, %1 : vector<77x3136xf32>
    %c0_1 = arith.constant 0 : index
    %c0_2 = arith.constant 0 : index
    %3 = vector.load %arg2[%c0_1, %c0_2] : memref<77x3136xf32, #tpu.memory_space<vmem>>, vector<77x3136xf32>
    tpu.vector_store %arg2[%c0_1, %c0_2], %2 {strides = array<i32>} : memref<77x3136xf32, #tpu.memory_space<vmem>>, vector<77x3136xf32>,
    return
  }
  func.func @transform_0(%arg0: i32) -> (i32, i32) {
    %c0_i32 = arith.constant 0 : i32
    %c0_i32_0 = arith.constant 0 : i32
    return %arg0, %c0_i32 : i32, i32
  }
  func.func @transform_1(%arg0: i32) -> (i32, i32) {
    %c0_i32 = arith.constant 0 : i32
    %c0_i32_0 = arith.constant 0 : i32
    return %arg0, %c0_i32 : i32, i32
  }
}

</mosaic_0001>

<bundles_post_ra>
// kernel: relu_pallas.1
= control target key start
LH: loop header
LB: loop body
LE: loop exit
PB: predicated region body
PF: predicated region fallthrough
CT: control target
= control target key end

     0   :  { %vm532_vm0 = vcmask 523264   ;;  %vm758_vm1 = vcmask 520192   ;;  %s2284_s0 = inlined_call_operand.vmem [shape: f32[77,3136], index: 0, kind: input, shape index: {}]   ;;  %s2285_s1 = inlined_call_operand.vmem [shape: f32[77,3136], index: 1, kind: output, shape index: {}]  }
   0x1   :  { %v8_v0 = vld [vmem:[%s2284_s0] sm:$0xff]  ;;  %v9_v1 = vld [vmem:[%s2284_s0 + $0x8] sm:$0xff]  ;;  %v10_v2 = vld [vmem:[%s2284_s0 + $0x10] sm:$0xff] }
   0x2   :  { %v258_v3 = vmax.f32 %v8_v0, 0.0  ;;  %v259_v4 = vmax.f32 %v9_v1, 0.0  ;;  %v260_v5 = vmax.f32 %v10_v2, 0.0  ;;  %v11_v6 = vld [vmem:[%s2284_s0 + $0x18] sm:$0xff]  ;;  %v12_v7 = vld [vmem:[%s2284_s0 + $0x20] sm:$0xff]  ;;  %v13_v8 = vld [vmem:[%s2284_s0 + $0x28] sm:$0xff] }
   0x3   :  { %v261_v9 = vmax.f32 %v11_v6, 0.0  ;;  %v262_v10 = vmax.f32 %v12_v7, 0.0  ;;  %v263_v11 = vmax.f32 %v13_v8, 0.0  ;;  %v14_v12 = vld [vmem:[%s2284_s0 + $0x30] sm:$0xff]  ;;  %v15_v13 = vld [vmem:[%s2284_s0 + $0x38] sm:$0xff]  ;;  %v16_v14 = vld [vmem:[%s2284_s0 + $0x40] sm:$0xff] }
   0x4   :  { %508 = vst [vmem:[%s2285_s1] sm:$0xff] %v258_v3  ;;  %509 = vst [vmem:[%s2285_s1 + $0x8] sm:$0xff] %v259_v4  ;;  %v264_v15 = vmax.f32 %v14_v12, 0.0  ;;  %v265_v16 = vmax.f32 %v15_v13, 0.0  ;;  %v266_v17 = vmax.f32 %v16_v14, 0.0  ;;  %v17_v18 = vld [vmem:[%s2284_s0 + $0x48] sm:$0xff]  ;;  %v18_v19 = vld [vmem:[%s2284_s0 + $0x50] sm:$0xff] }
   0x5   :  { %510 = vst [vmem:[%s2285_s1 + $0x10] sm:$0xff] %v260_v5  ;;  %v19_v20 = vld [vmem:[%s2284_s0 + $0x58] sm:$0xff]  ;;  %511 = vst [vmem:[%s2285_s1 + $0x18] sm:$0xff] %v261_v9  ;;  %v267_v21 = vmax.f32 %v17_v18, 0.0  ;;  %v268_v22 = vmax.f32 %v18_v19, 0.0  ;;  %v20_v24 = vld [vmem:[%s2284_s0 + $0x60] sm:$0xff] }
   0x6   :  { %512 = vst [vmem:[%s2285_s1 + $0x20] sm:$0xff] %v262_v10  ;;  %513 = vst [vmem:[%s2285_s1 + $0x28] sm:$0xff] %v263_v11  ;;  %v269_v23 = vmax.f32 %v19_v20, 0.0  ;;  %v21_v25 = vld [vmem:[%s2284_s0 + $0x68] sm:$0xff]  ;;  %v22_v26 = vld [vmem:[%s2284_s0 + $0x70] sm:$0xff]  ;;  %v270_v27 = vmax.f32 %v20_v24, 0.0 }
   0x7   :  { %514 = vst [vmem:[%s2285_s1 + $0x30] sm:$0xff] %v264_v15  ;;  %515 = vst [vmem:[%s2285_s1 + $0x38] sm:$0xff] %v265_v16  ;;  %v271_v28 = vmax.f32 %v21_v25, 0.0  ;;  %v272_v29 = vmax.f32 %v22_v26, 0.0  ;;  %v23_v30 = vld [vmem:[%s2284_s0 + $0x78] sm:$0xff]  ;;  %v24_v31 = vld [vmem:[%s2284_s0 + $0x80] sm:$0xff] }
   0x8   :  { %516 = vst [vmem:[%s2285_s1 + $0x40] sm:$0xff] %v266_v17  ;;  %v25_v32 = vld [vmem:[%s2284_s0 + $0x88] sm:$0xff]  ;;  %517 = vst [vmem:[%s2285_s1 + $0x48] sm:$0xff] %v267_v21  ;;  %v273_v33 = vmax.f32 %v23_v30, 0.0  ;;  %v274_v34 = vmax.f32 %v24_v31, 0.0  ;;  %v26_v36 = vld [vmem:[%s2284_s0 + $0x90] sm:$0xff] }
   0x9   :  { %518 = vst [vmem:[%s2285_s1 + $0x50] sm:$0xff] %v268_v22  ;;  %519 = vst [vmem:[%s2285_s1 + $0x58] sm:$0xff] %v269_v23  ;;  %v275_v35 = vmax.f32 %v25_v32, 0.0  ;;  %v27_v37 = vld [vmem:[%s2284_s0 + $0x98] sm:$0xff]  ;;  %v28_v38 = vld [vmem:[%s2284_s0 + $0xa0] sm:$0xff]  ;;  %v276_v39 = vmax.f32 %v26_v36, 0.0 }
   0xa   :  { %520 = vst [vmem:[%s2285_s1 + $0x60] sm:$0xff] %v270_v27  ;;  %521 = vst [vmem:[%s2285_s1 + $0x68] sm:$0xff] %v271_v28  ;;  %v277_v40 = vmax.f32 %v27_v37, 0.0  ;;  %v278_v41 = vmax.f32 %v28_v38, 0.0  ;;  %v29_v42 = vld [vmem:[%s2284_s0 + $0xa8] sm:$0xff]  ;;  %v30_v43 = vld [vmem:[%s2284_s0 + $0xb0] sm:$0xff] }
   0xb   :  { %522 = vst [vmem:[%s2285_s1 + $0x70] sm:$0xff] %v272_v29  ;;  %v31_v44 = vld [vmem:[%s2284_s0 + $0xb8] sm:$0xff]  ;;  %523 = vst [vmem:[%s2285_s1 + $0x78] sm:$0xff] %v273_v33  ;;  %v279_v45 = vmax.f32 %v29_v42, 0.0  ;;  %v280_v46 = vmax.f32 %v30_v43, 0.0  ;;  %v32_v48 = vld [vmem:[%s2284_s0 + $0xc0] sm:$0xff] }
   0xc   :  { %524 = vst [vmem:[%s2285_s1 + $0x80] sm:$0xff] %v274_v34  ;;  %525 = vst [vmem:[%s2285_s1 + $0x88] sm:$0xff] %v275_v35  ;;  %v281_v47 = vmax.f32 %v31_v44, 0.0  ;;  %v33_v49 = vld [vmem:[%s2284_s0 + $0xc8] sm:$0xff]  ;;  %v34_v50 = vld [vmem:[%s2284_s0 + $0xd0] sm:$0xff]  ;;  %v282_v51 = vmax.f32 %v32_v48, 0.0 }
   0xd   :  { %526 = vst [vmem:[%s2285_s1 + $0x90] sm:$0xff] %v276_v39  ;;  %527 = vst [vmem:[%s2285_s1 + $0x98] sm:$0xff] %v277_v40  ;;  %v283_v52 = vmax.f32 %v33_v49, 0.0  ;;  %v284_v53 = vmax.f32 %v34_v50, 0.0  ;;  %v35_v54 = vld [vmem:[%s2284_s0 + $0xd8] sm:$0xff]  ;;  %v36_v55 = vld [vmem:[%s2284_s0 + $0xe0] sm:$0xff] }
   0xe   :  { %528 = vst [vmem:[%s2285_s1 + $0xa0] sm:$0xff] %v278_v41  ;;  %v37_v56 = vld [vmem:[%s2284_s0 + $0xe8] sm:$0xff]  ;;  %529 = vst [vmem:[%s2285_s1 + $0xa8] sm:$0xff] %v279_v45  ;;  %v285_v57 = vmax.f32 %v35_v54, 0.0  ;;  %v286_v58 = vmax.f32 %v36_v55, 0.0  ;;  %v38_v60 = vld [vmem:[%s2284_s0 + $0xf0] sm:$0xff] }
   0xf   :  { %530 = vst [vmem:[%s2285_s1 + $0xb0] sm:$0xff] %v280_v46  ;;  %531 = vst [vmem:[%s2285_s1 + $0xb8] sm:$0xff] %v281_v47  ;;  %v287_v59 = vmax.f32 %v37_v56, 0.0  ;;  %v39_v61 = vld [vmem:[%s2284_s0 + $0xf8] sm:$0xff]  ;;  %v40_v62 = vld [vmem:[%s2284_s0 + $0x100] sm:$0xff]  ;;  %v288_v63 = vmax.f32 %v38_v60, 0.0 }
  0x10   :  { %533 = vst.msk [vmem:[%s2285_s1 + $0xc0] sm:$0xff] %vm532_vm0, %v282_v51  ;;  %534 = vst [vmem:[%s2285_s1 + $0xc8] sm:$0xff] %v283_v52  ;;  %v289_v0 = vmax.f32 %v39_v61, 0.0  ;;  %v290_v1 = vmax.f32 %v40_v62, 0.0  ;;  %v41_v2 = vld [vmem:[%s2284_s0 + $0x108] sm:$0xff]  ;;  %v42_v3 = vld [vmem:[%s2284_s0 + $0x110] sm:$0xff] }
  0x11   :  { %535 = vst [vmem:[%s2285_s1 + $0xd0] sm:$0xff] %v284_v53  ;;  %v43_v4 = vld [vmem:[%s2284_s0 + $0x118] sm:$0xff]  ;;  %536 = vst [vmem:[%s2285_s1 + $0xd8] sm:$0xff] %v285_v57  ;;  %v291_v5 = vmax.f32 %v41_v2, 0.0  ;;  %v292_v6 = vmax.f32 %v42_v3, 0.0  ;;  %v44_v8 = vld [vmem:[%s2284_s0 + $0x120] sm:$0xff] }
  0x12   :  { %537 = vst [vmem:[%s2285_s1 + $0xe0] sm:$0xff] %v286_v58  ;;  %538 = vst [vmem:[%s2285_s1 + $0xe8] sm:$0xff] %v287_v59  ;;  %v293_v7 = vmax.f32 %v43_v4, 0.0  ;;  %v45_v9 = vld [vmem:[%s2284_s0 + $0x128] sm:$0xff]  ;;  %v46_v10 = vld [vmem:[%s2284_s0 + $0x130] sm:$0xff]  ;;  %v294_v11 = vmax.f32 %v44_v8, 0.0 }
  0x13   :  { %539 = vst [vmem:[%s2285_s1 + $0xf0] sm:$0xff] %v288_v63  ;;  %540 = vst [vmem:[%s2285_s1 + $0xf8] sm:$0xff] %v289_v0  ;;  %v295_v12 = vmax.f32 %v45_v9, 0.0  ;;  %v296_v13 = vmax.f32 %v46_v10, 0.0  ;;  %v47_v14 = vld [vmem:[%s2284_s0 + $0x138] sm:$0xff]  ;;  %v48_v15 = vld [vmem:[%s2284_s0 + $0x140] sm:$0xff] }
  0x14   :  { %541 = vst [vmem:[%s2285_s1 + $0x100] sm:$0xff] %v290_v1  ;;  %v49_v16 = vld [vmem:[%s2284_s0 + $0x148] sm:$0xff]  ;;  %542 = vst [vmem:[%s2285_s1 + $0x108] sm:$0xff] %v291_v5  ;;  %v297_v17 = vmax.f32 %v47_v14, 0.0  ;;  %v298_v18 = vmax.f32 %v48_v15, 0.0  ;;  %v50_v20 = vld [vmem:[%s2284_s0 + $0x150] sm:$0xff] }
  0x15   :  { %543 = vst [vmem:[%s2285_s1 + $0x110] sm:$0xff] %v292_v6  ;;  %544 = vst [vmem:[%s2285_s1 + $0x118] sm:$0xff] %v293_v7  ;;  %v299_v19 = vmax.f32 %v49_v16, 0.0  ;;  %v51_v21 = vld [vmem:[%s2284_s0 + $0x158] sm:$0xff]  ;;  %v52_v22 = vld [vmem:[%s2284_s0 + $0x160] sm:$0xff]  ;;  %v300_v23 = vmax.f32 %v50_v20, 0.0 }
  0x16   :  { %545 = vst [vmem:[%s2285_s1 + $0x120] sm:$0xff] %v294_v11  ;;  %546 = vst [vmem:[%s2285_s1 + $0x128] sm:$0xff] %v295_v12  ;;  %v301_v24 = vmax.f32 %v51_v21, 0.0  ;;  %v302_v25 = vmax.f32 %v52_v22, 0.0  ;;  %v53_v26 = vld [vmem:[%s2284_s0 + $0x168] sm:$0xff]  ;;  %v54_v27 = vld [vmem:[%s2284_s0 + $0x170] sm:$0xff] }
  0x17   :  { %547 = vst [vmem:[%s2285_s1 + $0x130] sm:$0xff] %v296_v13  ;;  %v55_v28 = vld [vmem:[%s2284_s0 + $0x178] sm:$0xff]  ;;  %548 = vst [vmem:[%s2285_s1 + $0x138] sm:$0xff] %v297_v17  ;;  %v303_v29 = vmax.f32 %v53_v26, 0.0  ;;  %v304_v30 = vmax.f32 %v54_v27, 0.0  ;;  %v56_v32 = vld [vmem:[%s2284_s0 + $0x180] sm:$0xff] }
  0x18   :  { %549 = vst [vmem:[%s2285_s1 + $0x140] sm:$0xff] %v298_v18  ;;  %550 = vst [vmem:[%s2285_s1 + $0x148] sm:$0xff] %v299_v19  ;;  %v305_v31 = vmax.f32 %v55_v28, 0.0  ;;  %v57_v33 = vld [vmem:[%s2284_s0 + $0x188] sm:$0xff]  ;;  %v58_v34 = vld [vmem:[%s2284_s0 + $0x190] sm:$0xff]  ;;  %v306_v35 = vmax.f32 %v56_v32, 0.0 }
  0x19   :  { %551 = vst [vmem:[%s2285_s1 + $0x150] sm:$0xff] %v300_v23  ;;  %552 = vst [vmem:[%s2285_s1 + $0x158] sm:$0xff] %v301_v24  ;;  %v307_v36 = vmax.f32 %v57_v33, 0.0  ;;  %v308_v37 = vmax.f32 %v58_v34, 0.0  ;;  %v59_v38 = vld [vmem:[%s2284_s0 + $0x198] sm:$0xff]  ;;  %v60_v39 = vld [vmem:[%s2284_s0 + $0x1a0] sm:$0xff] }
  0x1a   :  { %553 = vst [vmem:[%s2285_s1 + $0x160] sm:$0xff] %v302_v25  ;;  %v61_v40 = vld [vmem:[%s2284_s0 + $0x1a8] sm:$0xff]  ;;  %554 = vst [vmem:[%s2285_s1 + $0x168] sm:$0xff] %v303_v29  ;;  %v309_v41 = vmax.f32 %v59_v38, 0.0  ;;  %v310_v42 = vmax.f32 %v60_v39, 0.0  ;;  %v62_v44 = vld [vmem:[%s2284_s0 + $0x1b0] sm:$0xff] }
  0x1b   :  { %555 = vst [vmem:[%s2285_s1 + $0x170] sm:$0xff] %v304_v30  ;;  %556 = vst [vmem:[%s2285_s1 + $0x178] sm:$0xff] %v305_v31  ;;  %v311_v43 = vmax.f32 %v61_v40, 0.0  ;;  %v63_v45 = vld [vmem:[%s2284_s0 + $0x1b8] sm:$0xff]  ;;  %v64_v46 = vld [vmem:[%s2284_s0 + $0x1c0] sm:$0xff]  ;;  %v312_v47 = vmax.f32 %v62_v44, 0.0 }
  0x1c   :  { %557 = vst [vmem:[%s2285_s1 + $0x180] sm:$0xff] %v306_v35  ;;  %558 = vst.msk [vmem:[%s2285_s1 + $0x188] sm:$0xff] %vm532_vm0, %v307_v36  ;;  %v313_v48 = vmax.f32 %v63_v45, 0.0  ;;  %v314_v49 = vmax.f32 %v64_v46, 0.0  ;;  %v65_v50 = vld [vmem:[%s2284_s0 + $0x1c8] sm:$0xff]  ;;  %v66_v51 = vld [vmem:[%s2284_s0 + $0x1d0] sm:$0xff] }
  0x1d   :  { %559 = vst [vmem:[%s2285_s1 + $0x190] sm:$0xff] %v308_v37  ;;  %v67_v52 = vld [vmem:[%s2284_s0 + $0x1d8] sm:$0xff]  ;;  %560 = vst [vmem:[%s2285_s1 + $0x198] sm:$0xff] %v309_v41  ;;  %v315_v53 = vmax.f32 %v65_v50, 0.0  ;;  %v316_v54 = vmax.f32 %v66_v51, 0.0  ;;  %v68_v56 = vld [vmem:[%s2284_s0 + $0x1e0] sm:$0xff] }
  0x1e   :  { %561 = vst [vmem:[%s2285_s1 + $0x1a0] sm:$0xff] %v310_v42  ;;  %562 = vst [vmem:[%s2285_s1 + $0x1a8] sm:$0xff] %v311_v43  ;;  %v317_v55 = vmax.f32 %v67_v52, 0.0  ;;  %v69_v57 = vld [vmem:[%s2284_s0 + $0x1e8] sm:$0xff]  ;;  %v70_v58 = vld [vmem:[%s2284_s0 + $0x1f0] sm:$0xff]  ;;  %v318_v59 = vmax.f32 %v68_v56, 0.0 }
  0x1f   :  { %563 = vst [vmem:[%s2285_s1 + $0x1b0] sm:$0xff] %v312_v47  ;;  %564 = vst [vmem:[%s2285_s1 + $0x1b8] sm:$0xff] %v313_v48  ;;  %v319_v60 = vmax.f32 %v69_v57, 0.0  ;;  %v320_v61 = vmax.f32 %v70_v58, 0.0  ;;  %v71_v62 = vld [vmem:[%s2284_s0 + $0x1f8] sm:$0xff]  ;;  %v72_v63 = vld [vmem:[%s2284_s0 + $0x200] sm:$0xff] }
  0x20   :  { %565 = vst [vmem:[%s2285_s1 + $0x1c0] sm:$0xff] %v314_v49  ;;  %v73_v0 = vld [vmem:[%s2284_s0 + $0x208] sm:$0xff]  ;;  %566 = vst [vmem:[%s2285_s1 + $0x1c8] sm:$0xff] %v315_v53  ;;  %v321_v1 = vmax.f32 %v71_v62, 0.0  ;;  %v322_v2 = vmax.f32 %v72_v63, 0.0  ;;  %v74_v4 = vld [vmem:[%s2284_s0 + $0x210] sm:$0xff] }
  0x21   :  { %567 = vst [vmem:[%s2285_s1 + $0x1d0] sm:$0xff] %v316_v54  ;;  %568 = vst [vmem:[%s2285_s1 + $0x1d8] sm:$0xff] %v317_v55  ;;  %v323_v3 = vmax.f32 %v73_v0, 0.0  ;;  %v75_v5 = vld [vmem:[%s2284_s0 + $0x218] sm:$0xff]  ;;  %v76_v6 = vld [vmem:[%s2284_s0 + $0x220] sm:$0xff]  ;;  %v324_v7 = vmax.f32 %v74_v4, 0.0 }
  0x22   :  { %569 = vst [vmem:[%s2285_s1 + $0x1e0] sm:$0xff] %v318_v59  ;;  %570 = vst [vmem:[%s2285_s1 + $0x1e8] sm:$0xff] %v319_v60  ;;  %v325_v8 = vmax.f32 %v75_v5, 0.0  ;;  %v326_v9 = vmax.f32 %v76_v6, 0.0  ;;  %v77_v10 = vld [vmem:[%s2284_s0 + $0x228] sm:$0xff]  ;;  %v78_v11 = vld [vmem:[%s2284_s0 + $0x230] sm:$0xff] }
  0x23   :  { %571 = vst [vmem:[%s2285_s1 + $0x1f0] sm:$0xff] %v320_v61  ;;  %v79_v12 = vld [vmem:[%s2284_s0 + $0x238] sm:$0xff]  ;;  %572 = vst [vmem:[%s2285_s1 + $0x1f8] sm:$0xff] %v321_v1  ;;  %v327_v13 = vmax.f32 %v77_v10, 0.0  ;;  %v328_v14 = vmax.f32 %v78_v11, 0.0  ;;  %v80_v16 = vld [vmem:[%s2284_s0 + $0x240] sm:$0xff] }
  0x24   :  { %573 = vst [vmem:[%s2285_s1 + $0x200] sm:$0xff] %v322_v2  ;;  %574 = vst [vmem:[%s2285_s1 + $0x208] sm:$0xff] %v323_v3  ;;  %v329_v15 = vmax.f32 %v79_v12, 0.0  ;;  %v81_v17 = vld [vmem:[%s2284_s0 + $0x248] sm:$0xff]  ;;  %v82_v18 = vld [vmem:[%s2284_s0 + $0x250] sm:$0xff]  ;;  %v330_v19 = vmax.f32 %v80_v16, 0.0 }
  0x25   :  { %575 = vst [vmem:[%s2285_s1 + $0x210] sm:$0xff] %v324_v7  ;;  %576 = vst [vmem:[%s2285_s1 + $0x218] sm:$0xff] %v325_v8  ;;  %v331_v20 = vmax.f32 %v81_v17, 0.0  ;;  %v332_v21 = vmax.f32 %v82_v18, 0.0  ;;  %v83_v22 = vld [vmem:[%s2284_s0 + $0x258] sm:$0xff]  ;;  %v84_v23 = vld [vmem:[%s2284_s0 + $0x260] sm:$0xff] }
  0x26   :  { %577 = vst [vmem:[%s2285_s1 + $0x220] sm:$0xff] %v326_v9  ;;  %v85_v24 = vld [vmem:[%s2284_s0 + $0x268] sm:$0xff]  ;;  %578 = vst [vmem:[%s2285_s1 + $0x228] sm:$0xff] %v327_v13  ;;  %v333_v25 = vmax.f32 %v83_v22, 0.0  ;;  %v334_v26 = vmax.f32 %v84_v23, 0.0  ;;  %v86_v28 = vld [vmem:[%s2284_s0 + $0x270] sm:$0xff] }
  0x27   :  { %579 = vst [vmem:[%s2285_s1 + $0x230] sm:$0xff] %v328_v14  ;;  %580 = vst [vmem:[%s2285_s1 + $0x238] sm:$0xff] %v329_v15  ;;  %v335_v27 = vmax.f32 %v85_v24, 0.0  ;;  %v87_v29 = vld [vmem:[%s2284_s0 + $0x278] sm:$0xff]  ;;  %v88_v30 = vld [vmem:[%s2284_s0 + $0x280] sm:$0xff]  ;;  %v336_v31 = vmax.f32 %v86_v28, 0.0 }
  0x28   :  { %581 = vst [vmem:[%s2285_s1 + $0x240] sm:$0xff] %v330_v19  ;;  %582 = vst [vmem:[%s2285_s1 + $0x248] sm:$0xff] %v331_v20  ;;  %v337_v32 = vmax.f32 %v87_v29, 0.0  ;;  %v338_v33 = vmax.f32 %v88_v30, 0.0  ;;  %v89_v34 = vld [vmem:[%s2284_s0 + $0x288] sm:$0xff]  ;;  %v90_v35 = vld [vmem:[%s2284_s0 + $0x290] sm:$0xff] }
  0x29   :  { %583 = vst.msk [vmem:[%s2285_s1 + $0x250] sm:$0xff] %vm532_vm0, %v332_v21  ;;  %v91_v36 = vld [vmem:[%s2284_s0 + $0x298] sm:$0xff]  ;;  %584 = vst [vmem:[%s2285_s1 + $0x258] sm:$0xff] %v333_v25  ;;  %v339_v37 = vmax.f32 %v89_v34, 0.0  ;;  %v340_v38 = vmax.f32 %v90_v35, 0.0  ;;  %v92_v40 = vld [vmem:[%s2284_s0 + $0x2a0] sm:$0xff] }
  0x2a   :  { %585 = vst [vmem:[%s2285_s1 + $0x260] sm:$0xff] %v334_v26  ;;  %586 = vst [vmem:[%s2285_s1 + $0x268] sm:$0xff] %v335_v27  ;;  %v341_v39 = vmax.f32 %v91_v36, 0.0  ;;  %v93_v41 = vld [vmem:[%s2284_s0 + $0x2a8] sm:$0xff]  ;;  %v94_v42 = vld [vmem:[%s2284_s0 + $0x2b0] sm:$0xff]  ;;  %v342_v43 = vmax.f32 %v92_v40, 0.0 }
  0x2b   :  { %587 = vst [vmem:[%s2285_s1 + $0x270] sm:$0xff] %v336_v31  ;;  %588 = vst [vmem:[%s2285_s1 + $0x278] sm:$0xff] %v337_v32  ;;  %v343_v44 = vmax.f32 %v93_v41, 0.0  ;;  %v344_v45 = vmax.f32 %v94_v42, 0.0  ;;  %v95_v46 = vld [vmem:[%s2284_s0 + $0x2b8] sm:$0xff]  ;;  %v96_v47 = vld [vmem:[%s2284_s0 + $0x2c0] sm:$0xff] }
  0x2c   :  { %589 = vst [vmem:[%s2285_s1 + $0x280] sm:$0xff] %v338_v33  ;;  %v97_v48 = vld [vmem:[%s2284_s0 + $0x2c8] sm:$0xff]  ;;  %590 = vst [vmem:[%s2285_s1 + $0x288] sm:$0xff] %v339_v37  ;;  %v345_v49 = vmax.f32 %v95_v46, 0.0  ;;  %v346_v50 = vmax.f32 %v96_v47, 0.0  ;;  %v98_v52 = vld [vmem:[%s2284_s0 + $0x2d0] sm:$0xff] }
  0x2d   :  { %591 = vst [vmem:[%s2285_s1 + $0x290] sm:$0xff] %v340_v38  ;;  %592 = vst [vmem:[%s2285_s1 + $0x298] sm:$0xff] %v341_v39  ;;  %v347_v51 = vmax.f32 %v97_v48, 0.0  ;;  %v99_v53 = vld [vmem:[%s2284_s0 + $0x2d8] sm:$0xff]  ;;  %v100_v54 = vld [vmem:[%s2284_s0 + $0x2e0] sm:$0xff]  ;;  %v348_v55 = vmax.f32 %v98_v52, 0.0 }
  0x2e   :  { %593 = vst [vmem:[%s2285_s1 + $0x2a0] sm:$0xff] %v342_v43  ;;  %594 = vst [vmem:[%s2285_s1 + $0x2a8] sm:$0xff] %v343_v44  ;;  %v349_v56 = vmax.f32 %v99_v53, 0.0  ;;  %v350_v57 = vmax.f32 %v100_v54, 0.0  ;;  %v101_v58 = vld [vmem:[%s2284_s0 + $0x2e8] sm:$0xff]  ;;  %v102_v59 = vld [vmem:[%s2284_s0 + $0x2f0] sm:$0xff] }
  0x2f   :  { %595 = vst [vmem:[%s2285_s1 + $0x2b0] sm:$0xff] %v344_v45  ;;  %v103_v60 = vld [vmem:[%s2284_s0 + $0x2f8] sm:$0xff]  ;;  %596 = vst [vmem:[%s2285_s1 + $0x2b8] sm:$0xff] %v345_v49  ;;  %v351_v61 = vmax.f32 %v101_v58, 0.0  ;;  %v352_v62 = vmax.f32 %v102_v59, 0.0  ;;  %v104_v0 = vld [vmem:[%s2284_s0 + $0x300] sm:$0xff] }
  0x30   :  { %597 = vst [vmem:[%s2285_s1 + $0x2c0] sm:$0xff] %v346_v50  ;;  %598 = vst [vmem:[%s2285_s1 + $0x2c8] sm:$0xff] %v347_v51  ;;  %v353_v63 = vmax.f32 %v103_v60, 0.0  ;;  %v105_v1 = vld [vmem:[%s2284_s0 + $0x308] sm:$0xff]  ;;  %v106_v2 = vld [vmem:[%s2284_s0 + $0x310] sm:$0xff]  ;;  %v354_v3 = vmax.f32 %v104_v0, 0.0 }
  0x31   :  { %599 = vst [vmem:[%s2285_s1 + $0x2d0] sm:$0xff] %v348_v55  ;;  %600 = vst [vmem:[%s2285_s1 + $0x2d8] sm:$0xff] %v349_v56  ;;  %v355_v4 = vmax.f32 %v105_v1, 0.0  ;;  %v356_v5 = vmax.f32 %v106_v2, 0.0  ;;  %v107_v6 = vld [vmem:[%s2284_s0 + $0x318] sm:$0xff]  ;;  %v108_v7 = vld [vmem:[%s2284_s0 + $0x320] sm:$0xff] }
  0x32   :  { %601 = vst [vmem:[%s2285_s1 + $0x2e0] sm:$0xff] %v350_v57  ;;  %v109_v8 = vld [vmem:[%s2284_s0 + $0x328] sm:$0xff]  ;;  %602 = vst [vmem:[%s2285_s1 + $0x2e8] sm:$0xff] %v351_v61  ;;  %v357_v9 = vmax.f32 %v107_v6, 0.0  ;;  %v358_v10 = vmax.f32 %v108_v7, 0.0  ;;  %v110_v12 = vld [vmem:[%s2284_s0 + $0x330] sm:$0xff] }
  0x33   :  { %603 = vst [vmem:[%s2285_s1 + $0x2f0] sm:$0xff] %v352_v62  ;;  %604 = vst [vmem:[%s2285_s1 + $0x2f8] sm:$0xff] %v353_v63  ;;  %v359_v11 = vmax.f32 %v109_v8, 0.0  ;;  %v111_v13 = vld [vmem:[%s2284_s0 + $0x338] sm:$0xff]  ;;  %v112_v14 = vld [vmem:[%s2284_s0 + $0x340] sm:$0xff]  ;;  %v360_v15 = vmax.f32 %v110_v12, 0.0 }
  0x34   :  { %605 = vst [vmem:[%s2285_s1 + $0x300] sm:$0xff] %v354_v3  ;;  %606 = vst [vmem:[%s2285_s1 + $0x308] sm:$0xff] %v355_v4  ;;  %v361_v16 = vmax.f32 %v111_v13, 0.0  ;;  %v362_v17 = vmax.f32 %v112_v14, 0.0  ;;  %v113_v18 = vld [vmem:[%s2284_s0 + $0x348] sm:$0xff]  ;;  %v114_v19 = vld [vmem:[%s2284_s0 + $0x350] sm:$0xff] }
  0x35   :  { %607 = vst [vmem:[%s2285_s1 + $0x310] sm:$0xff] %v356_v5  ;;  %v115_v20 = vld [vmem:[%s2284_s0 + $0x358] sm:$0xff]  ;;  %608 = vst.msk [vmem:[%s2285_s1 + $0x318] sm:$0xff] %vm532_vm0, %v357_v9  ;;  %v363_v21 = vmax.f32 %v113_v18, 0.0  ;;  %v364_v22 = vmax.f32 %v114_v19, 0.0  ;;  %v116_v24 = vld [vmem:[%s2284_s0 + $0x360] sm:$0xff] }
  0x36   :  { %609 = vst [vmem:[%s2285_s1 + $0x320] sm:$0xff] %v358_v10  ;;  %610 = vst [vmem:[%s2285_s1 + $0x328] sm:$0xff] %v359_v11  ;;  %v365_v23 = vmax.f32 %v115_v20, 0.0  ;;  %v117_v25 = vld [vmem:[%s2284_s0 + $0x368] sm:$0xff]  ;;  %v118_v26 = vld [vmem:[%s2284_s0 + $0x370] sm:$0xff]  ;;  %v366_v27 = vmax.f32 %v116_v24, 0.0 }
  0x37   :  { %611 = vst [vmem:[%s2285_s1 + $0x330] sm:$0xff] %v360_v15  ;;  %612 = vst [vmem:[%s2285_s1 + $0x338] sm:$0xff] %v361_v16  ;;  %v367_v28 = vmax.f32 %v117_v25, 0.0  ;;  %v368_v29 = vmax.f32 %v118_v26, 0.0  ;;  %v119_v30 = vld [vmem:[%s2284_s0 + $0x378] sm:$0xff]  ;;  %v120_v31 = vld [vmem:[%s2284_s0 + $0x380] sm:$0xff] }
  0x38   :  { %613 = vst [vmem:[%s2285_s1 + $0x340] sm:$0xff] %v362_v17  ;;  %v121_v32 = vld [vmem:[%s2284_s0 + $0x388] sm:$0xff]  ;;  %614 = vst [vmem:[%s2285_s1 + $0x348] sm:$0xff] %v363_v21  ;;  %v369_v33 = vmax.f32 %v119_v30, 0.0  ;;  %v370_v34 = vmax.f32 %v120_v31, 0.0  ;;  %v122_v36 = vld [vmem:[%s2284_s0 + $0x390] sm:$0xff] }
  0x39   :  { %615 = vst [vmem:[%s2285_s1 + $0x350] sm:$0xff] %v364_v22  ;;  %616 = vst [vmem:[%s2285_s1 + $0x358] sm:$0xff] %v365_v23  ;;  %v371_v35 = vmax.f32 %v121_v32, 0.0  ;;  %v123_v37 = vld [vmem:[%s2284_s0 + $0x398] sm:$0xff]  ;;  %v124_v38 = vld [vmem:[%s2284_s0 + $0x3a0] sm:$0xff]  ;;  %v372_v39 = vmax.f32 %v122_v36, 0.0 }
  0x3a   :  { %617 = vst [vmem:[%s2285_s1 + $0x360] sm:$0xff] %v366_v27  ;;  %618 = vst [vmem:[%s2285_s1 + $0x368] sm:$0xff] %v367_v28  ;;  %v373_v40 = vmax.f32 %v123_v37, 0.0  ;;  %v374_v41 = vmax.f32 %v124_v38, 0.0  ;;  %v125_v42 = vld [vmem:[%s2284_s0 + $0x3a8] sm:$0xff]  ;;  %v126_v43 = vld [vmem:[%s2284_s0 + $0x3b0] sm:$0xff] }
  0x3b   :  { %619 = vst [vmem:[%s2285_s1 + $0x370] sm:$0xff] %v368_v29  ;;  %v127_v44 = vld [vmem:[%s2284_s0 + $0x3b8] sm:$0xff]  ;;  %620 = vst [vmem:[%s2285_s1 + $0x378] sm:$0xff] %v369_v33  ;;  %v375_v45 = vmax.f32 %v125_v42, 0.0  ;;  %v376_v46 = vmax.f32 %v126_v43, 0.0  ;;  %v128_v48 = vld [vmem:[%s2284_s0 + $0x3c0] sm:$0xff] }
  0x3c   :  { %621 = vst [vmem:[%s2285_s1 + $0x380] sm:$0xff] %v370_v34  ;;  %622 = vst [vmem:[%s2285_s1 + $0x388] sm:$0xff] %v371_v35  ;;  %v377_v47 = vmax.f32 %v127_v44, 0.0  ;;  %v129_v49 = vld [vmem:[%s2284_s0 + $0x3c8] sm:$0xff]  ;;  %v130_v50 = vld [vmem:[%s2284_s0 + $0x3d0] sm:$0xff]  ;;  %v378_v51 = vmax.f32 %v128_v48, 0.0 }
  0x3d   :  { %623 = vst [vmem:[%s2285_s1 + $0x390] sm:$0xff] %v372_v39  ;;  %624 = vst [vmem:[%s2285_s1 + $0x398] sm:$0xff] %v373_v40  ;;  %v379_v52 = vmax.f32 %v129_v49, 0.0  ;;  %v380_v53 = vmax.f32 %v130_v50, 0.0  ;;  %v131_v54 = vld [vmem:[%s2284_s0 + $0x3d8] sm:$0xff]  ;;  %v132_v55 = vld [vmem:[%s2284_s0 + $0x3e0] sm:$0xff] }
  0x3e   :  { %625 = vst [vmem:[%s2285_s1 + $0x3a0] sm:$0xff] %v374_v41  ;;  %v133_v56 = vld [vmem:[%s2284_s0 + $0x3e8] sm:$0xff]  ;;  %626 = vst [vmem:[%s2285_s1 + $0x3a8] sm:$0xff] %v375_v45  ;;  %v381_v57 = vmax.f32 %v131_v54, 0.0  ;;  %v382_v58 = vmax.f32 %v132_v55, 0.0  ;;  %v134_v60 = vld [vmem:[%s2284_s0 + $0x3f0] sm:$0xff] }
  0x3f   :  { %627 = vst [vmem:[%s2285_s1 + $0x3b0] sm:$0xff] %v376_v46  ;;  %628 = vst [vmem:[%s2285_s1 + $0x3b8] sm:$0xff] %v377_v47  ;;  %v383_v59 = vmax.f32 %v133_v56, 0.0  ;;  %v135_v61 = vld [vmem:[%s2284_s0 + $0x3f8] sm:$0xff]  ;;  %v136_v62 = vld [vmem:[%s2284_s0 + $0x400] sm:$0xff]  ;;  %v384_v63 = vmax.f32 %v134_v60, 0.0 }
  0x40   :  { %629 = vst [vmem:[%s2285_s1 + $0x3c0] sm:$0xff] %v378_v51  ;;  %630 = vst [vmem:[%s2285_s1 + $0x3c8] sm:$0xff] %v379_v52  ;;  %v385_v0 = vmax.f32 %v135_v61, 0.0  ;;  %v386_v1 = vmax.f32 %v136_v62, 0.0  ;;  %v137_v2 = vld [vmem:[%s2284_s0 + $0x408] sm:$0xff]  ;;  %v138_v3 = vld [vmem:[%s2284_s0 + $0x410] sm:$0xff] }
  0x41   :  { %631 = vst [vmem:[%s2285_s1 + $0x3d0] sm:$0xff] %v380_v53  ;;  %v139_v4 = vld [vmem:[%s2284_s0 + $0x418] sm:$0xff]  ;;  %632 = vst [vmem:[%s2285_s1 + $0x3d8] sm:$0xff] %v381_v57  ;;  %v387_v5 = vmax.f32 %v137_v2, 0.0  ;;  %v388_v6 = vmax.f32 %v138_v3, 0.0  ;;  %v140_v8 = vld [vmem:[%s2284_s0 + $0x420] sm:$0xff] }
  0x42   :  { %633 = vst.msk [vmem:[%s2285_s1 + $0x3e0] sm:$0xff] %vm532_vm0, %v382_v58  ;;  %634 = vst [vmem:[%s2285_s1 + $0x3e8] sm:$0xff] %v383_v59  ;;  %v389_v7 = vmax.f32 %v139_v4, 0.0  ;;  %v141_v9 = vld [vmem:[%s2284_s0 + $0x428] sm:$0xff]  ;;  %v142_v10 = vld [vmem:[%s2284_s0 + $0x430] sm:$0xff]  ;;  %v390_v11 = vmax.f32 %v140_v8, 0.0 }
  0x43   :  { %635 = vst [vmem:[%s2285_s1 + $0x3f0] sm:$0xff] %v384_v63  ;;  %636 = vst [vmem:[%s2285_s1 + $0x3f8] sm:$0xff] %v385_v0  ;;  %v391_v12 = vmax.f32 %v141_v9, 0.0  ;;  %v392_v13 = vmax.f32 %v142_v10, 0.0  ;;  %v143_v14 = vld [vmem:[%s2284_s0 + $0x438] sm:$0xff]  ;;  %v144_v15 = vld [vmem:[%s2284_s0 + $0x440] sm:$0xff] }
  0x44   :  { %637 = vst [vmem:[%s2285_s1 + $0x400] sm:$0xff] %v386_v1  ;;  %v145_v16 = vld [vmem:[%s2284_s0 + $0x448] sm:$0xff]  ;;  %638 = vst [vmem:[%s2285_s1 + $0x408] sm:$0xff] %v387_v5  ;;  %v393_v17 = vmax.f32 %v143_v14, 0.0  ;;  %v394_v18 = vmax.f32 %v144_v15, 0.0  ;;  %v146_v20 = vld [vmem:[%s2284_s0 + $0x450] sm:$0xff] }
  0x45   :  { %639 = vst [vmem:[%s2285_s1 + $0x410] sm:$0xff] %v388_v6  ;;  %640 = vst [vmem:[%s2285_s1 + $0x418] sm:$0xff] %v389_v7  ;;  %v395_v19 = vmax.f32 %v145_v16, 0.0  ;;  %v147_v21 = vld [vmem:[%s2284_s0 + $0x458] sm:$0xff]  ;;  %v148_v22 = vld [vmem:[%s2284_s0 + $0x460] sm:$0xff]  ;;  %v396_v23 = vmax.f32 %v146_v20, 0.0 }
  0x46   :  { %641 = vst [vmem:[%s2285_s1 + $0x420] sm:$0xff] %v390_v11  ;;  %642 = vst [vmem:[%s2285_s1 + $0x428] sm:$0xff] %v391_v12  ;;  %v397_v24 = vmax.f32 %v147_v21, 0.0  ;;  %v398_v25 = vmax.f32 %v148_v22, 0.0  ;;  %v149_v26 = vld [vmem:[%s2284_s0 + $0x468] sm:$0xff]  ;;  %v150_v27 = vld [vmem:[%s2284_s0 + $0x470] sm:$0xff] }
  0x47   :  { %643 = vst [vmem:[%s2285_s1 + $0x430] sm:$0xff] %v392_v13  ;;  %v151_v28 = vld [vmem:[%s2284_s0 + $0x478] sm:$0xff]  ;;  %644 = vst [vmem:[%s2285_s1 + $0x438] sm:$0xff] %v393_v17  ;;  %v399_v29 = vmax.f32 %v149_v26, 0.0  ;;  %v400_v30 = vmax.f32 %v150_v27, 0.0  ;;  %v152_v32 = vld [vmem:[%s2284_s0 + $0x480] sm:$0xff] }
  0x48   :  { %645 = vst [vmem:[%s2285_s1 + $0x440] sm:$0xff] %v394_v18  ;;  %646 = vst [vmem:[%s2285_s1 + $0x448] sm:$0xff] %v395_v19  ;;  %v401_v31 = vmax.f32 %v151_v28, 0.0  ;;  %v153_v33 = vld [vmem:[%s2284_s0 + $0x488] sm:$0xff]  ;;  %v154_v34 = vld [vmem:[%s2284_s0 + $0x490] sm:$0xff]  ;;  %v402_v35 = vmax.f32 %v152_v32, 0.0 }
  0x49   :  { %647 = vst [vmem:[%s2285_s1 + $0x450] sm:$0xff] %v396_v23  ;;  %648 = vst [vmem:[%s2285_s1 + $0x458] sm:$0xff] %v397_v24  ;;  %v403_v36 = vmax.f32 %v153_v33, 0.0  ;;  %v404_v37 = vmax.f32 %v154_v34, 0.0  ;;  %v155_v38 = vld [vmem:[%s2284_s0 + $0x498] sm:$0xff]  ;;  %v156_v39 = vld [vmem:[%s2284_s0 + $0x4a0] sm:$0xff] }
  0x4a   :  { %649 = vst [vmem:[%s2285_s1 + $0x460] sm:$0xff] %v398_v25  ;;  %v157_v40 = vld [vmem:[%s2284_s0 + $0x4a8] sm:$0xff]  ;;  %650 = vst [vmem:[%s2285_s1 + $0x468] sm:$0xff] %v399_v29  ;;  %v405_v41 = vmax.f32 %v155_v38, 0.0  ;;  %v406_v42 = vmax.f32 %v156_v39, 0.0  ;;  %v158_v44 = vld [vmem:[%s2284_s0 + $0x4b0] sm:$0xff] }
  0x4b   :  { %651 = vst [vmem:[%s2285_s1 + $0x470] sm:$0xff] %v400_v30  ;;  %652 = vst [vmem:[%s2285_s1 + $0x478] sm:$0xff] %v401_v31  ;;  %v407_v43 = vmax.f32 %v157_v40, 0.0  ;;  %v159_v45 = vld [vmem:[%s2284_s0 + $0x4b8] sm:$0xff]  ;;  %v160_v46 = vld [vmem:[%s2284_s0 + $0x4c0] sm:$0xff]  ;;  %v408_v47 = vmax.f32 %v158_v44, 0.0 }
  0x4c   :  { %653 = vst [vmem:[%s2285_s1 + $0x480] sm:$0xff] %v402_v35  ;;  %654 = vst [vmem:[%s2285_s1 + $0x488] sm:$0xff] %v403_v36  ;;  %v409_v48 = vmax.f32 %v159_v45, 0.0  ;;  %v410_v49 = vmax.f32 %v160_v46, 0.0  ;;  %v161_v50 = vld [vmem:[%s2284_s0 + $0x4c8] sm:$0xff]  ;;  %v162_v51 = vld [vmem:[%s2284_s0 + $0x4d0] sm:$0xff] }
  0x4d   :  { %655 = vst [vmem:[%s2285_s1 + $0x490] sm:$0xff] %v404_v37  ;;  %v163_v52 = vld [vmem:[%s2284_s0 + $0x4d8] sm:$0xff]  ;;  %656 = vst [vmem:[%s2285_s1 + $0x498] sm:$0xff] %v405_v41  ;;  %v411_v53 = vmax.f32 %v161_v50, 0.0  ;;  %v412_v54 = vmax.f32 %v162_v51, 0.0  ;;  %v164_v56 = vld [vmem:[%s2284_s0 + $0x4e0] sm:$0xff] }
  0x4e   :  { %657 = vst [vmem:[%s2285_s1 + $0x4a0] sm:$0xff] %v406_v42  ;;  %658 = vst.msk [vmem:[%s2285_s1 + $0x4a8] sm:$0xff] %vm532_vm0, %v407_v43  ;;  %v413_v55 = vmax.f32 %v163_v52, 0.0  ;;  %v165_v57 = vld [vmem:[%s2284_s0 + $0x4e8] sm:$0xff]  ;;  %v166_v58 = vld [vmem:[%s2284_s0 + $0x4f0] sm:$0xff]  ;;  %v414_v59 = vmax.f32 %v164_v56, 0.0 }
  0x4f   :  { %659 = vst [vmem:[%s2285_s1 + $0x4b0] sm:$0xff] %v408_v47  ;;  %660 = vst [vmem:[%s2285_s1 + $0x4b8] sm:$0xff] %v409_v48  ;;  %v415_v60 = vmax.f32 %v165_v57, 0.0  ;;  %v416_v61 = vmax.f32 %v166_v58, 0.0  ;;  %v167_v62 = vld [vmem:[%s2284_s0 + $0x4f8] sm:$0xff]  ;;  %v168_v63 = vld [vmem:[%s2284_s0 + $0x500] sm:$0xff] }
  0x50   :  { %661 = vst [vmem:[%s2285_s1 + $0x4c0] sm:$0xff] %v410_v49  ;;  %v169_v0 = vld [vmem:[%s2284_s0 + $0x508] sm:$0xff]  ;;  %662 = vst [vmem:[%s2285_s1 + $0x4c8] sm:$0xff] %v411_v53  ;;  %v417_v1 = vmax.f32 %v167_v62, 0.0  ;;  %v418_v2 = vmax.f32 %v168_v63, 0.0  ;;  %v170_v4 = vld [vmem:[%s2284_s0 + $0x510] sm:$0xff] }
  0x51   :  { %663 = vst [vmem:[%s2285_s1 + $0x4d0] sm:$0xff] %v412_v54  ;;  %664 = vst [vmem:[%s2285_s1 + $0x4d8] sm:$0xff] %v413_v55  ;;  %v419_v3 = vmax.f32 %v169_v0, 0.0  ;;  %v171_v5 = vld [vmem:[%s2284_s0 + $0x518] sm:$0xff]  ;;  %v172_v6 = vld [vmem:[%s2284_s0 + $0x520] sm:$0xff]  ;;  %v420_v7 = vmax.f32 %v170_v4, 0.0 }
  0x52   :  { %665 = vst [vmem:[%s2285_s1 + $0x4e0] sm:$0xff] %v414_v59  ;;  %666 = vst [vmem:[%s2285_s1 + $0x4e8] sm:$0xff] %v415_v60  ;;  %v421_v8 = vmax.f32 %v171_v5, 0.0  ;;  %v422_v9 = vmax.f32 %v172_v6, 0.0  ;;  %v173_v10 = vld [vmem:[%s2284_s0 + $0x528] sm:$0xff]  ;;  %v174_v11 = vld [vmem:[%s2284_s0 + $0x530] sm:$0xff] }
  0x53   :  { %667 = vst [vmem:[%s2285_s1 + $0x4f0] sm:$0xff] %v416_v61  ;;  %v175_v12 = vld [vmem:[%s2284_s0 + $0x538] sm:$0xff]  ;;  %668 = vst [vmem:[%s2285_s1 + $0x4f8] sm:$0xff] %v417_v1  ;;  %v423_v13 = vmax.f32 %v173_v10, 0.0  ;;  %v424_v14 = vmax.f32 %v174_v11, 0.0  ;;  %v176_v16 = vld [vmem:[%s2284_s0 + $0x540] sm:$0xff] }
  0x54   :  { %669 = vst [vmem:[%s2285_s1 + $0x500] sm:$0xff] %v418_v2  ;;  %670 = vst [vmem:[%s2285_s1 + $0x508] sm:$0xff] %v419_v3  ;;  %v425_v15 = vmax.f32 %v175_v12, 0.0  ;;  %v177_v17 = vld [vmem:[%s2284_s0 + $0x548] sm:$0xff]  ;;  %v178_v18 = vld [vmem:[%s2284_s0 + $0x550] sm:$0xff]  ;;  %v426_v19 = vmax.f32 %v176_v16, 0.0 }
  0x55   :  { %671 = vst [vmem:[%s2285_s1 + $0x510] sm:$0xff] %v420_v7  ;;  %672 = vst [vmem:[%s2285_s1 + $0x518] sm:$0xff] %v421_v8  ;;  %v427_v20 = vmax.f32 %v177_v17, 0.0  ;;  %v428_v21 = vmax.f32 %v178_v18, 0.0  ;;  %v179_v22 = vld [vmem:[%s2284_s0 + $0x558] sm:$0xff]  ;;  %v180_v23 = vld [vmem:[%s2284_s0 + $0x560] sm:$0xff] }
  0x56   :  { %673 = vst [vmem:[%s2285_s1 + $0x520] sm:$0xff] %v422_v9  ;;  %v181_v24 = vld [vmem:[%s2284_s0 + $0x568] sm:$0xff]  ;;  %674 = vst [vmem:[%s2285_s1 + $0x528] sm:$0xff] %v423_v13  ;;  %v429_v25 = vmax.f32 %v179_v22, 0.0  ;;  %v430_v26 = vmax.f32 %v180_v23, 0.0  ;;  %v182_v28 = vld [vmem:[%s2284_s0 + $0x570] sm:$0xff] }
  0x57   :  { %675 = vst [vmem:[%s2285_s1 + $0x530] sm:$0xff] %v424_v14  ;;  %676 = vst [vmem:[%s2285_s1 + $0x538] sm:$0xff] %v425_v15  ;;  %v431_v27 = vmax.f32 %v181_v24, 0.0  ;;  %v183_v29 = vld [vmem:[%s2284_s0 + $0x578] sm:$0xff]  ;;  %v184_v30 = vld [vmem:[%s2284_s0 + $0x580] sm:$0xff]  ;;  %v432_v31 = vmax.f32 %v182_v28, 0.0 }
  0x58   :  { %677 = vst [vmem:[%s2285_s1 + $0x540] sm:$0xff] %v426_v19  ;;  %678 = vst [vmem:[%s2285_s1 + $0x548] sm:$0xff] %v427_v20  ;;  %v433_v32 = vmax.f32 %v183_v29, 0.0  ;;  %v434_v33 = vmax.f32 %v184_v30, 0.0  ;;  %v185_v34 = vld [vmem:[%s2284_s0 + $0x588] sm:$0xff]  ;;  %v186_v35 = vld [vmem:[%s2284_s0 + $0x590] sm:$0xff] }
  0x59   :  { %679 = vst [vmem:[%s2285_s1 + $0x550] sm:$0xff] %v428_v21  ;;  %v187_v36 = vld [vmem:[%s2284_s0 + $0x598] sm:$0xff]  ;;  %680 = vst [vmem:[%s2285_s1 + $0x558] sm:$0xff] %v429_v25  ;;  %v435_v37 = vmax.f32 %v185_v34, 0.0  ;;  %v436_v38 = vmax.f32 %v186_v35, 0.0  ;;  %v188_v40 = vld [vmem:[%s2284_s0 + $0x5a0] sm:$0xff] }
  0x5a   :  { %681 = vst [vmem:[%s2285_s1 + $0x560] sm:$0xff] %v430_v26  ;;  %682 = vst [vmem:[%s2285_s1 + $0x568] sm:$0xff] %v431_v27  ;;  %v437_v39 = vmax.f32 %v187_v36, 0.0  ;;  %v189_v41 = vld [vmem:[%s2284_s0 + $0x5a8] sm:$0xff]  ;;  %v190_v42 = vld [vmem:[%s2284_s0 + $0x5b0] sm:$0xff]  ;;  %v438_v43 = vmax.f32 %v188_v40, 0.0 }
  0x5b   :  { %683 = vst.msk [vmem:[%s2285_s1 + $0x570] sm:$0xff] %vm532_vm0, %v432_v31  ;;  %684 = vst [vmem:[%s2285_s1 + $0x578] sm:$0xff] %v433_v32  ;;  %v439_v44 = vmax.f32 %v189_v41, 0.0  ;;  %v440_v45 = vmax.f32 %v190_v42, 0.0  ;;  %v191_v46 = vld [vmem:[%s2284_s0 + $0x5b8] sm:$0xff]  ;;  %v192_v47 = vld [vmem:[%s2284_s0 + $0x5c0] sm:$0xff] }
  0x5c   :  { %685 = vst [vmem:[%s2285_s1 + $0x580] sm:$0xff] %v434_v33  ;;  %v193_v48 = vld [vmem:[%s2284_s0 + $0x5c8] sm:$0xff]  ;;  %686 = vst [vmem:[%s2285_s1 + $0x588] sm:$0xff] %v435_v37  ;;  %v441_v49 = vmax.f32 %v191_v46, 0.0  ;;  %v442_v50 = vmax.f32 %v192_v47, 0.0  ;;  %v194_v52 = vld [vmem:[%s2284_s0 + $0x5d0] sm:$0xff] }
  0x5d   :  { %687 = vst [vmem:[%s2285_s1 + $0x590] sm:$0xff] %v436_v38  ;;  %688 = vst [vmem:[%s2285_s1 + $0x598] sm:$0xff] %v437_v39  ;;  %v443_v51 = vmax.f32 %v193_v48, 0.0  ;;  %v195_v53 = vld [vmem:[%s2284_s0 + $0x5d8] sm:$0xff]  ;;  %v196_v54 = vld [vmem:[%s2284_s0 + $0x5e0] sm:$0xff]  ;;  %v444_v55 = vmax.f32 %v194_v52, 0.0 }
  0x5e   :  { %689 = vst [vmem:[%s2285_s1 + $0x5a0] sm:$0xff] %v438_v43  ;;  %690 = vst [vmem:[%s2285_s1 + $0x5a8] sm:$0xff] %v439_v44  ;;  %v445_v56 = vmax.f32 %v195_v53, 0.0  ;;  %v446_v57 = vmax.f32 %v196_v54, 0.0  ;;  %v197_v58 = vld [vmem:[%s2284_s0 + $0x5e8] sm:$0xff]  ;;  %v198_v59 = vld [vmem:[%s2284_s0 + $0x5f0] sm:$0xff] }
  0x5f   :  { %691 = vst [vmem:[%s2285_s1 + $0x5b0] sm:$0xff] %v440_v45  ;;  %v199_v60 = vld [vmem:[%s2284_s0 + $0x5f8] sm:$0xff]  ;;  %692 = vst [vmem:[%s2285_s1 + $0x5b8] sm:$0xff] %v441_v49  ;;  %v447_v61 = vmax.f32 %v197_v58, 0.0  ;;  %v448_v62 = vmax.f32 %v198_v59, 0.0  ;;  %v200_v0 = vld [vmem:[%s2284_s0 + $0x600] sm:$0xff] }
  0x60   :  { %693 = vst [vmem:[%s2285_s1 + $0x5c0] sm:$0xff] %v442_v50  ;;  %694 = vst [vmem:[%s2285_s1 + $0x5c8] sm:$0xff] %v443_v51  ;;  %v449_v63 = vmax.f32 %v199_v60, 0.0  ;;  %v201_v1 = vld [vmem:[%s2284_s0 + $0x608] sm:$0xff]  ;;  %v202_v2 = vld [vmem:[%s2284_s0 + $0x610] sm:$0xff]  ;;  %v450_v3 = vmax.f32 %v200_v0, 0.0 }
  0x61   :  { %695 = vst [vmem:[%s2285_s1 + $0x5d0] sm:$0xff] %v444_v55  ;;  %696 = vst [vmem:[%s2285_s1 + $0x5d8] sm:$0xff] %v445_v56  ;;  %v451_v4 = vmax.f32 %v201_v1, 0.0  ;;  %v452_v5 = vmax.f32 %v202_v2, 0.0  ;;  %v203_v6 = vld [vmem:[%s2284_s0 + $0x618] sm:$0xff]  ;;  %v204_v7 = vld [vmem:[%s2284_s0 + $0x620] sm:$0xff] }
  0x62   :  { %697 = vst [vmem:[%s2285_s1 + $0x5e0] sm:$0xff] %v446_v57  ;;  %v205_v8 = vld [vmem:[%s2284_s0 + $0x628] sm:$0xff]  ;;  %698 = vst [vmem:[%s2285_s1 + $0x5e8] sm:$0xff] %v447_v61  ;;  %v453_v9 = vmax.f32 %v203_v6, 0.0  ;;  %v454_v10 = vmax.f32 %v204_v7, 0.0  ;;  %v206_v12 = vld [vmem:[%s2284_s0 + $0x630] sm:$0xff] }
  0x63   :  { %699 = vst [vmem:[%s2285_s1 + $0x5f0] sm:$0xff] %v448_v62  ;;  %700 = vst [vmem:[%s2285_s1 + $0x5f8] sm:$0xff] %v449_v63  ;;  %v455_v11 = vmax.f32 %v205_v8, 0.0  ;;  %v207_v13 = vld [vmem:[%s2284_s0 + $0x638] sm:$0xff]  ;;  %v208_v14 = vld [vmem:[%s2284_s0 + $0x640] sm:$0xff]  ;;  %v456_v15 = vmax.f32 %v206_v12, 0.0 }
  0x64   :  { %701 = vst [vmem:[%s2285_s1 + $0x600] sm:$0xff] %v450_v3  ;;  %702 = vst [vmem:[%s2285_s1 + $0x608] sm:$0xff] %v451_v4  ;;  %v457_v16 = vmax.f32 %v207_v13, 0.0  ;;  %v458_v17 = vmax.f32 %v208_v14, 0.0  ;;  %v209_v18 = vld [vmem:[%s2284_s0 + $0x648] sm:$0xff]  ;;  %v210_v19 = vld [vmem:[%s2284_s0 + $0x650] sm:$0xff] }
  0x65   :  { %703 = vst [vmem:[%s2285_s1 + $0x610] sm:$0xff] %v452_v5  ;;  %v211_v20 = vld [vmem:[%s2284_s0 + $0x658] sm:$0xff]  ;;  %704 = vst [vmem:[%s2285_s1 + $0x618] sm:$0xff] %v453_v9  ;;  %v459_v21 = vmax.f32 %v209_v18, 0.0  ;;  %v460_v22 = vmax.f32 %v210_v19, 0.0  ;;  %v212_v24 = vld [vmem:[%s2284_s0 + $0x660] sm:$0xff] }
  0x66   :  { %705 = vst [vmem:[%s2285_s1 + $0x620] sm:$0xff] %v454_v10  ;;  %706 = vst [vmem:[%s2285_s1 + $0x628] sm:$0xff] %v455_v11  ;;  %v461_v23 = vmax.f32 %v211_v20, 0.0  ;;  %v213_v25 = vld [vmem:[%s2284_s0 + $0x668] sm:$0xff]  ;;  %v214_v26 = vld [vmem:[%s2284_s0 + $0x670] sm:$0xff]  ;;  %v462_v27 = vmax.f32 %v212_v24, 0.0 }
  0x67   :  { %707 = vst [vmem:[%s2285_s1 + $0x630] sm:$0xff] %v456_v15  ;;  %708 = vst.msk [vmem:[%s2285_s1 + $0x638] sm:$0xff] %vm532_vm0, %v457_v16  ;;  %v463_v28 = vmax.f32 %v213_v25, 0.0  ;;  %v464_v29 = vmax.f32 %v214_v26, 0.0  ;;  %v215_v30 = vld [vmem:[%s2284_s0 + $0x678] sm:$0xff]  ;;  %v216_v31 = vld [vmem:[%s2284_s0 + $0x680] sm:$0xff] }
  0x68   :  { %709 = vst [vmem:[%s2285_s1 + $0x640] sm:$0xff] %v458_v17  ;;  %v217_v32 = vld [vmem:[%s2284_s0 + $0x688] sm:$0xff]  ;;  %710 = vst [vmem:[%s2285_s1 + $0x648] sm:$0xff] %v459_v21  ;;  %v465_v33 = vmax.f32 %v215_v30, 0.0  ;;  %v466_v34 = vmax.f32 %v216_v31, 0.0  ;;  %v218_v36 = vld [vmem:[%s2284_s0 + $0x690] sm:$0xff] }
  0x69   :  { %711 = vst [vmem:[%s2285_s1 + $0x650] sm:$0xff] %v460_v22  ;;  %712 = vst [vmem:[%s2285_s1 + $0x658] sm:$0xff] %v461_v23  ;;  %v467_v35 = vmax.f32 %v217_v32, 0.0  ;;  %v219_v37 = vld [vmem:[%s2284_s0 + $0x698] sm:$0xff]  ;;  %v220_v38 = vld [vmem:[%s2284_s0 + $0x6a0] sm:$0xff]  ;;  %v468_v39 = vmax.f32 %v218_v36, 0.0 }
  0x6a   :  { %713 = vst [vmem:[%s2285_s1 + $0x660] sm:$0xff] %v462_v27  ;;  %714 = vst [vmem:[%s2285_s1 + $0x668] sm:$0xff] %v463_v28  ;;  %v469_v40 = vmax.f32 %v219_v37, 0.0  ;;  %v470_v41 = vmax.f32 %v220_v38, 0.0  ;;  %v221_v42 = vld [vmem:[%s2284_s0 + $0x6a8] sm:$0xff]  ;;  %v222_v43 = vld [vmem:[%s2284_s0 + $0x6b0] sm:$0xff] }
  0x6b   :  { %715 = vst [vmem:[%s2285_s1 + $0x670] sm:$0xff] %v464_v29  ;;  %v223_v44 = vld [vmem:[%s2284_s0 + $0x6b8] sm:$0xff]  ;;  %716 = vst [vmem:[%s2285_s1 + $0x678] sm:$0xff] %v465_v33  ;;  %v471_v45 = vmax.f32 %v221_v42, 0.0  ;;  %v472_v46 = vmax.f32 %v222_v43, 0.0  ;;  %v224_v48 = vld [vmem:[%s2284_s0 + $0x6c0] sm:$0xff] }
  0x6c   :  { %717 = vst [vmem:[%s2285_s1 + $0x680] sm:$0xff] %v466_v34  ;;  %718 = vst [vmem:[%s2285_s1 + $0x688] sm:$0xff] %v467_v35  ;;  %v473_v47 = vmax.f32 %v223_v44, 0.0  ;;  %v225_v49 = vld [vmem:[%s2284_s0 + $0x6c8] sm:$0xff]  ;;  %v226_v50 = vld [vmem:[%s2284_s0 + $0x6d0] sm:$0xff]  ;;  %v474_v51 = vmax.f32 %v224_v48, 0.0 }
  0x6d   :  { %719 = vst [vmem:[%s2285_s1 + $0x690] sm:$0xff] %v468_v39  ;;  %720 = vst [vmem:[%s2285_s1 + $0x698] sm:$0xff] %v469_v40  ;;  %v475_v52 = vmax.f32 %v225_v49, 0.0  ;;  %v476_v53 = vmax.f32 %v226_v50, 0.0  ;;  %v227_v54 = vld [vmem:[%s2284_s0 + $0x6d8] sm:$0xff]  ;;  %v228_v55 = vld [vmem:[%s2284_s0 + $0x6e0] sm:$0xff] }
  0x6e   :  { %721 = vst [vmem:[%s2285_s1 + $0x6a0] sm:$0xff] %v470_v41  ;;  %v229_v56 = vld [vmem:[%s2284_s0 + $0x6e8] sm:$0xff]  ;;  %722 = vst [vmem:[%s2285_s1 + $0x6a8] sm:$0xff] %v471_v45  ;;  %v477_v57 = vmax.f32 %v227_v54, 0.0  ;;  %v478_v58 = vmax.f32 %v228_v55, 0.0  ;;  %v230_v60 = vld [vmem:[%s2284_s0 + $0x6f0] sm:$0xff] }
  0x6f   :  { %723 = vst [vmem:[%s2285_s1 + $0x6b0] sm:$0xff] %v472_v46  ;;  %724 = vst [vmem:[%s2285_s1 + $0x6b8] sm:$0xff] %v473_v47  ;;  %v479_v59 = vmax.f32 %v229_v56, 0.0  ;;  %v231_v61 = vld [vmem:[%s2284_s0 + $0x6f8] sm:$0xff]  ;;  %v232_v62 = vld [vmem:[%s2284_s0 + $0x700] sm:$0xff]  ;;  %v480_v63 = vmax.f32 %v230_v60, 0.0 }
  0x70   :  { %725 = vst [vmem:[%s2285_s1 + $0x6c0] sm:$0xff] %v474_v51  ;;  %726 = vst [vmem:[%s2285_s1 + $0x6c8] sm:$0xff] %v475_v52  ;;  %v481_v0 = vmax.f32 %v231_v61, 0.0  ;;  %v482_v1 = vmax.f32 %v232_v62, 0.0  ;;  %v233_v2 = vld [vmem:[%s2284_s0 + $0x708] sm:$0x1f] }
  0x71   :  { %727 = vst [vmem:[%s2285_s1 + $0x6d0] sm:$0xff] %v476_v53  ;;  %728 = vst [vmem:[%s2285_s1 + $0x6d8] sm:$0xff] %v477_v57  ;;  %v483_v3 = vmax.f32 %v233_v2, 0.0  ;;  %v234_v4 = vld [vmem:[%s2284_s0 + $0x710] sm:$0x1f] }
  0x72   :  { %729 = vst [vmem:[%s2285_s1 + $0x6e0] sm:$0xff] %v478_v58  ;;  %730 = vst [vmem:[%s2285_s1 + $0x6e8] sm:$0xff] %v479_v59  ;;  %v235_v5 = vld [vmem:[%s2284_s0 + $0x718] sm:$0x1f]  ;;  %v484_v6 = vmax.f32 %v234_v4, 0.0 }
  0x73   :  { %731 = vst [vmem:[%s2285_s1 + $0x6f0] sm:$0xff] %v480_v63  ;;  %732 = vst [vmem:[%s2285_s1 + $0x6f8] sm:$0xff] %v481_v0  ;;  %v485_v7 = vmax.f32 %v235_v5, 0.0  ;;  %v236_v8 = vld [vmem:[%s2284_s0 + $0x720] sm:$0x1f] }
  0x74   :  { %733 = vst.msk [vmem:[%s2285_s1 + $0x700] sm:$0xff] %vm532_vm0, %v482_v1  ;;  %v237_v9 = vld [vmem:[%s2284_s0 + $0x728] sm:$0x1f]  ;;  %734 = vst [vmem:[%s2285_s1 + $0x708] sm:$0x1f] %v483_v3  ;;  %v486_v10 = vmax.f32 %v236_v8, 0.0 }
  0x75   :  { %v487_v11 = vmax.f32 %v237_v9, 0.0  ;;  %v238_v12 = vld [vmem:[%s2284_s0 + $0x730] sm:$0x1f]  ;;  %v239_v13 = vld [vmem:[%s2284_s0 + $0x738] sm:$0x1f] }
  0x76   :  { %735 = vst [vmem:[%s2285_s1 + $0x710] sm:$0x1f] %v484_v6  ;;  %736 = vst [vmem:[%s2285_s1 + $0x718] sm:$0x1f] %v485_v7  ;;  %v488_v14 = vmax.f32 %v238_v12, 0.0  ;;  %v489_v15 = vmax.f32 %v239_v13, 0.0 }
  0x77   :  { %v240_v16 = vld [vmem:[%s2284_s0 + $0x740] sm:$0x1f]  ;;  %v241_v17 = vld [vmem:[%s2284_s0 + $0x748] sm:$0x1f]  ;;  %737 = vst [vmem:[%s2285_s1 + $0x720] sm:$0x1f] %v486_v10 }
  0x78   :  { %738 = vst [vmem:[%s2285_s1 + $0x728] sm:$0x1f] %v487_v11  ;;  %v490_v18 = vmax.f32 %v240_v16, 0.0  ;;  %v491_v19 = vmax.f32 %v241_v17, 0.0  ;;  %v242_v20 = vld [vmem:[%s2284_s0 + $0x750] sm:$0x1f] }
  0x79   :  { %v243_v21 = vld [vmem:[%s2284_s0 + $0x758] sm:$0x1f]  ;;  %739 = vst [vmem:[%s2285_s1 + $0x730] sm:$0x1f] %v488_v14  ;;  %740 = vst [vmem:[%s2285_s1 + $0x738] sm:$0x1f] %v489_v15 }
  0x7a   :  { %v492_v22 = vmax.f32 %v242_v20, 0.0  ;;  %v493_v23 = vmax.f32 %v243_v21, 0.0  ;;  %v244_v24 = vld [vmem:[%s2284_s0 + $0x760] sm:$0x1f]  ;;  %v245_v25 = vld [vmem:[%s2284_s0 + $0x768] sm:$0x1f] }
  0x7b   :  { %741 = vst [vmem:[%s2285_s1 + $0x740] sm:$0x1f] %v490_v18  ;;  %742 = vst [vmem:[%s2285_s1 + $0x748] sm:$0x1f] %v491_v19  ;;  %v494_v26 = vmax.f32 %v244_v24, 0.0  ;;  %v495_v27 = vmax.f32 %v245_v25, 0.0 }
  0x7c   :  { %v246_v28 = vld [vmem:[%s2284_s0 + $0x770] sm:$0x1f]  ;;  %v247_v29 = vld [vmem:[%s2284_s0 + $0x778] sm:$0x1f]  ;;  %743 = vst [vmem:[%s2285_s1 + $0x750] sm:$0x1f] %v492_v22 }
  0x7d   :  { %744 = vst [vmem:[%s2285_s1 + $0x758] sm:$0x1f] %v493_v23  ;;  %v496_v30 = vmax.f32 %v246_v28, 0.0  ;;  %v497_v31 = vmax.f32 %v247_v29, 0.0  ;;  %v248_v32 = vld [vmem:[%s2284_s0 + $0x780] sm:$0x1f] }
  0x7e   :  { %v249_v33 = vld [vmem:[%s2284_s0 + $0x788] sm:$0x1f]  ;;  %745 = vst [vmem:[%s2285_s1 + $0x760] sm:$0x1f] %v494_v26  ;;  %746 = vst [vmem:[%s2285_s1 + $0x768] sm:$0x1f] %v495_v27 }
  0x7f   :  { %v498_v34 = vmax.f32 %v248_v32, 0.0  ;;  %v499_v35 = vmax.f32 %v249_v33, 0.0  ;;  %v250_v36 = vld [vmem:[%s2284_s0 + $0x790] sm:$0x1f]  ;;  %v251_v37 = vld [vmem:[%s2284_s0 + $0x798] sm:$0x1f] }
  0x80   :  { %747 = vst [vmem:[%s2285_s1 + $0x770] sm:$0x1f] %v496_v30  ;;  %748 = vst [vmem:[%s2285_s1 + $0x778] sm:$0x1f] %v497_v31  ;;  %v500_v38 = vmax.f32 %v250_v36, 0.0  ;;  %v501_v39 = vmax.f32 %v251_v37, 0.0 }
  0x81   :  { %v252_v40 = vld [vmem:[%s2284_s0 + $0x7a0] sm:$0x1f]  ;;  %v253_v41 = vld [vmem:[%s2284_s0 + $0x7a8] sm:$0x1f]  ;;  %749 = vst [vmem:[%s2285_s1 + $0x780] sm:$0x1f] %v498_v34 }
  0x82   :  { %750 = vst [vmem:[%s2285_s1 + $0x788] sm:$0x1f] %v499_v35  ;;  %v502_v42 = vmax.f32 %v252_v40, 0.0  ;;  %v503_v43 = vmax.f32 %v253_v41, 0.0  ;;  %v254_v44 = vld [vmem:[%s2284_s0 + $0x7b0] sm:$0x1f] }
  0x83   :  { %v255_v45 = vld [vmem:[%s2284_s0 + $0x7b8] sm:$0x1f]  ;;  %751 = vst [vmem:[%s2285_s1 + $0x790] sm:$0x1f] %v500_v38  ;;  %752 = vst [vmem:[%s2285_s1 + $0x798] sm:$0x1f] %v501_v39 }
  0x84   :  { %v504_v46 = vmax.f32 %v254_v44, 0.0  ;;  %v505_v47 = vmax.f32 %v255_v45, 0.0  ;;  %v256_v48 = vld [vmem:[%s2284_s0 + $0x7c0] sm:$0x1f]  ;;  %v257_v49 = vld [vmem:[%s2284_s0 + $0x7c8] sm:$0x1f] }
  0x85   :  { %753 = vst [vmem:[%s2285_s1 + $0x7a0] sm:$0x1f] %v502_v42  ;;  %754 = vst [vmem:[%s2285_s1 + $0x7a8] sm:$0x1f] %v503_v43  ;;  %v506_v50 = vmax.f32 %v256_v48, 0.0  ;;  %v507_v51 = vmax.f32 %v257_v49, 0.0 }
  0x86   :  { %755 = vst [vmem:[%s2285_s1 + $0x7b0] sm:$0x1f] %v504_v46  ;;  %756 = vst [vmem:[%s2285_s1 + $0x7b8] sm:$0x1f] %v505_v47 }
  0x87   :  { %757 = vst [vmem:[%s2285_s1 + $0x7c0] sm:$0x1f] %v506_v50  ;;  %759 = vst.msk [vmem:[%s2285_s1 + $0x7c8] sm:$0x1f] %vm758_vm1, %v507_v51 }

</bundles_post_ra>
